<compile_context>
chip_gen: v6e
topology: v6e:2x2x1
jax: 0.10.0
libtpu: 0.0.40
codegen_flags: <defaults>
</compile_context>

<pallas_src>
import jax
import jax.numpy as jnp
from jax.experimental import pallas as pl
from jax.experimental.pallas import tpu as pltpu

_LANE = 1024          # lane-dense last dim (multiple of 128)
_MAX_BLOCK_ROWS = 512  # 512 x 1024 f32 = 2 MiB per tile; ~8 MiB with double-buffered in+out


def _make_affine_kernel(a: float, b: float):
    # a, b are Python floats at trace time -> baked in as constants (no SMEM loads).
    def kernel(x_ref, o_ref):
        o_ref[...] = a * x_ref[...] + b
    return kernel


def _round_up(n: int, m: int) -> int:
    return ((n + m - 1) // m) * m


def simple_model_forward(x, a: float = 1.0, b: float = 0.0):
    """Computes a * x + b, matching SimpleModel.forward, for any input shape."""
    orig_shape = x.shape
    total = x.size

    # Lane-dense flat layout: pad to (rows_padded, _LANE) with rows_padded % block_rows == 0.
    rows = pl.cdiv(total, _LANE)
    block_rows = min(_MAX_BLOCK_ROWS, _round_up(rows, 8))
    rows_padded = _round_up(rows, block_rows)
    padded_total = rows_padded * _LANE

    x_flat = x.reshape(-1)
    if padded_total != total:
        x_flat = jnp.pad(x_flat, (0, padded_total - total))
    x2d = x_flat.reshape(rows_padded, _LANE)

    grid_rows = rows_padded // block_rows
    itemsize = jnp.dtype(x.dtype).itemsize

    out2d = pl.pallas_call(
        _make_affine_kernel(a, b),
        out_shape=jax.ShapeDtypeStruct((rows_padded, _LANE), x.dtype),
        grid_spec=pltpu.PrefetchScalarGridSpec(
            num_scalar_prefetch=0,
            grid=(grid_rows,),
            in_specs=[pl.BlockSpec((block_rows, _LANE), lambda i: (i, 0))],
            out_specs=pl.BlockSpec((block_rows, _LANE), lambda i: (i, 0)),
        ),
        compiler_params=pltpu.CompilerParams(
            # Embarrassingly parallel elementwise op: let v7x megacore shard grid steps.
            dimension_semantics=("parallel",),
        ),
        cost_estimate=pl.CostEstimate(
            flops=2 * padded_total,            # one mul + one add per element
            transcendentals=0,
            bytes_accessed=2 * padded_total * itemsize,  # read x, write out
        ),
    )(x2d)

    out_flat = out2d.reshape(-1)
    if padded_total != total:
        out_flat = out_flat[:total]
    return out_flat.reshape(orig_shape)


if __name__ == "__main__":
    # ModelConfig defaults: a=1.0, b=0.0; use non-trivial values to exercise the math.
    a, b = 2.5, -1.25
    key = jax.random.PRNGKey(0)
    x = jax.random.normal(key, (2, 4, 16, 16), dtype=jnp.float32)

    out = simple_model_forward(x, a=a, b=b)
    out = jax.block_until_ready(out)

    ref = a * x + b
    assert out.shape == x.shape and out.dtype == x.dtype
    assert jnp.allclose(out, ref, atol=1e-6, rtol=1e-6)
    print("KERNEL_OK")
</pallas_src>

<mosaic_0001>
module attributes {stable_mosaic.version = 11 : i64} {
  func.func @kernel(%arg0: i32, %arg1: memref<8x1024xf32, #tpu.memory_space<vmem>>, %arg2: memref<8x1024xf32, #tpu.memory_space<vmem>>) attributes {dimension_semantics = [#tpu.dimension_semantics<parallel>], iteration_bounds = array<i64: 1>, scalar_prefetch = 0 : i64, scratch_operands = 0 : i64, tpu.core_type = #tpu.core_type<tc>, window_params = [{transform_indices = @transform_0, window_bounds = array<i64: 8, 1024>}, {transform_indices = @transform_1, window_bounds = array<i64: 8, 1024>}]} {
    %c0 = arith.constant 0 : index
    %c0_0 = arith.constant 0 : index
    %0 = vector.load %arg1[%c0, %c0_0] : memref<8x1024xf32, #tpu.memory_space<vmem>>, vector<8x1024xf32>
    %cst = arith.constant 2.500000e+00 : f32
    %1 = vector.broadcast %cst : f32 to vector<8x1024xf32>
    %2 = arith.mulf %1, %0 : vector<8x1024xf32>
    %cst_1 = arith.constant -1.250000e+00 : f32
    %3 = vector.broadcast %cst_1 : f32 to vector<8x1024xf32>
    %4 = arith.addf %2, %3 : vector<8x1024xf32>
    %c0_2 = arith.constant 0 : index
    %c0_3 = arith.constant 0 : index
    %5 = vector.load %arg2[%c0_2, %c0_3] : memref<8x1024xf32, #tpu.memory_space<vmem>>, vector<8x1024xf32>
    tpu.vector_store %arg2[%c0_2, %c0_3], %4 {strides = array<i32>} : memref<8x1024xf32, #tpu.memory_space<vmem>>, vector<8x1024xf32>,
    return
  }
  func.func @transform_0(%arg0: i32) -> (i32, i32) {
    %c0_i32 = arith.constant 0 : i32
    %c0_i32_0 = arith.constant 0 : i32
    return %arg0, %c0_i32 : i32, i32
  }
  func.func @transform_1(%arg0: i32) -> (i32, i32) {
    %c0_i32 = arith.constant 0 : i32
    %c0_i32_0 = arith.constant 0 : i32
    return %arg0, %c0_i32 : i32, i32
  }
}

</mosaic_0001>

<bundles_post_ra>
// kernel: tpu_custom_call.1
= control target key start
LH: loop header
LB: loop body
LE: loop exit
PB: predicated region body
PF: predicated region fallthrough
CT: control target
= control target key end

     0   :  { %6 = vsyncpa [#allocation3], 0  ;;  %s132_s0 = inlined_call_operand.hbm [shape: f32[8,1024], index: 0, kind: input, shape index: {}]   ;;  %s133_s1 = inlined_call_operand.hbm [shape: f32[8,1024], index: 1, kind: output, shape index: {}]  }
   0x1   :  { %7 = vsyncpa [#allocation4], 0  ;;  %s114_s6 = smov [#allocation2]  }
   0x2   :  { %s14_s7 = sshll.u32 %s114_s6, 4  ;;  %s15_s7 = int_to_ptr.vmem [resolvable:$true] %s14_s7 }
   0x3   :  { %s78_s8 = scalar_lea.vmem %s15_s7, 1024  ;;  %p83_p1 = scmp.lt.s32.totalorder %s15_s7, %s15_s7 }
   0x4   :  { %p79_p0 = scmp.ne.s32.totalorder %s15_s7, %s78_s8  ;;  %p84_p2 = scmp.lt.s32.totalorder %s78_s8, %s78_s8 }
   0x6   :  { %p85_p3 = por %p84_p2, %p83_p1 }
   0x8   :  { %p86_p4 = pnand %p85_p3, %p79_p0 }
   0xa   :  { %89 = shalt.err (!%p86_p4)
}
   0xb   :  { %17 = dma.hbm_to_vmem [thread:$0]  %s132_s0, 1024, %s15_s7, [#allocation3]  }
   0xc   :  { %110 = dma.done.wait [#allocation3], 1024  }
   0xd   :  { %111 = vsyncadd [#allocation3], 4294966272  ;;  %v21_v0 = vld [vmem:[#allocation2] sm:$0xff]  ;;  %v22_v1 = vld [vmem:[#allocation2 + $0x8] sm:$0xff]  ;;  %s115_s0 = smov [#allocation5]  }
   0xe   :  { %v23_v2 = vld [vmem:[#allocation2 + $0x10] sm:$0xff]  ;;  %v29_v3 = vmul.f32 2.5, %v21_v0  ;;  %v30_v4 = vmul.f32 2.5, %v22_v1  ;;  %v24_v6 = vld [vmem:[#allocation2 + $0x18] sm:$0xff]  ;;  %v25_v7 = vld [vmem:[#allocation2 + $0x20] sm:$0xff]  ;;  %s59_s11 = sshll.u32 %s115_s0, 4  ;;  %s60_s11 = int_to_ptr.vmem [resolvable:$true] %s59_s11 }
   0xf   :  { %v31_v5 = vmul.f32 2.5, %v23_v2  ;;  %v26_v8 = vld [vmem:[#allocation2 + $0x28] sm:$0xff]  ;;  %v32_v9 = vmul.f32 2.5, %v24_v6  ;;  %v33_v10 = vmul.f32 2.5, %v25_v7  ;;  %v27_v12 = vld [vmem:[#allocation2 + $0x30] sm:$0xff]  ;;  %v28_v13 = vld [vmem:[#allocation2 + $0x38] sm:$0xff]  ;;  %p95_p6 = scmp.lt.s32.totalorder %s60_s11, %s60_s11 }
  0x10   :  { %v34_v11 = vmul.f32 2.5, %v26_v8  ;;  %v37_v14 = vadd.f32 -1.25, %v29_v3  ;;  %v38_v15 = vadd.f32 -1.25, %v30_v4  ;;  %v35_v17 = vmul.f32 2.5, %v27_v12  ;;  %s90_s12 = scalar_lea.vmem %s60_s11, 1024 }
  0x11   :  { %v39_v16 = vadd.f32 -1.25, %v31_v5  ;;  %v40_v18 = vadd.f32 -1.25, %v32_v9  ;;  %v41_v19 = vadd.f32 -1.25, %v33_v10  ;;  %v36_v21 = vmul.f32 2.5, %v28_v13  ;;  %p91_p5 = scmp.ne.s32.totalorder %s60_s11, %s90_s12  ;;  %p96_p7 = scmp.lt.s32.totalorder %s90_s12, %s90_s12 }
  0x12   :  { %v42_v20 = vadd.f32 -1.25, %v34_v11  ;;  %45 = vst [vmem:[#allocation5] sm:$0xff] %v37_v14  ;;  %46 = vst [vmem:[#allocation5 + $0x8] sm:$0xff] %v38_v15  ;;  %v43_v22 = vadd.f32 -1.25, %v35_v17 }
  0x13   :  { %47 = vst [vmem:[#allocation5 + $0x10] sm:$0xff] %v39_v16  ;;  %48 = vst [vmem:[#allocation5 + $0x18] sm:$0xff] %v40_v18  ;;  %v44_v23 = vadd.f32 -1.25, %v36_v21  ;;  %p97_p8 = por %p96_p7, %p95_p6 }
  0x14   :  { %49 = vst [vmem:[#allocation5 + $0x20] sm:$0xff] %v41_v19  ;;  %50 = vst [vmem:[#allocation5 + $0x28] sm:$0xff] %v42_v20 }
  0x15   :  { %51 = vst [vmem:[#allocation5 + $0x30] sm:$0xff] %v43_v22  ;;  %52 = vst [vmem:[#allocation5 + $0x38] sm:$0xff] %v44_v23  ;;  %p98_p9 = pnand %p97_p8, %p91_p5 }
  0x17   :  { %101 = shalt.err (!%p98_p9)
}
  0x18   :  { %62 = dma.vmem_to_hbm [thread:$0]  %s60_s11, 1024, %s133_s1, [#allocation4]  }
  0x19   :  { %112 = dma.done.wait [#allocation4], 1024  }
  0x1a   :  { %113 = vsyncadd [#allocation4], 4294966272 }
  0x1b   :  { %66 = vsyncpa [#allocation3], 1 }
  0x1c   :  { %67 = vsyncpa [#allocation4], 1 }

</bundles_post_ra>
